<compile_context>
chip_gen: v6e
topology: v6e:2x2x1
jax: 0.10.0
libtpu: 0.0.40
codegen_flags: <defaults>
</compile_context>

<pallas_src>
import math
from functools import partial

import jax
import jax.numpy as jnp
from jax.experimental import pallas as pl
from jax.experimental.pallas import tpu as pltpu

_LANE = 128
_SUBLANE = 8


def _round_up(n, m):
    return ((n + m - 1) // m) * m


def _mlp_kernel(*refs, num_hidden, act, matmul_dtype):
    # refs = (x, w0, b0, w1, b1, ..., w_fc, b_fc, logits_out, penultimate_out)
    x_ref = refs[0]
    param_refs = refs[1:1 + 2 * (num_hidden + 1)]
    logits_ref, pen_ref = refs[-2], refs[-1]

    h_mm = x_ref[...]                       # already matmul_dtype (bf16)
    pen_f32 = h_mm.astype(jnp.float32)

    # hidden LinearBlocks: linear -> act_func (act_func=None => Identity)
    for i in range(num_hidden):
        w = param_refs[2 * i][...]          # matmul_dtype
        b = param_refs[2 * i + 1][...]      # f32, [1, d_out]
        h = jnp.dot(h_mm, w, preferred_element_type=jnp.float32) + b
        if act == "relu":
            h = jnp.maximum(h, 0.0)
        pen_f32 = h
        h_mm = h.astype(matmul_dtype)

    # penultimate activations (lane-dense, padded cols sliced off in wrapper)
    pen_ref[...] = pen_f32.astype(pen_ref.dtype)

    # final fc layer (no activation)
    w_fc = param_refs[-2][...]
    b_fc = param_refs[-1][...]
    logits = jnp.dot(h_mm, w_fc, preferred_element_type=jnp.float32) + b_fc
    logits_ref[...] = logits.astype(logits_ref.dtype)


def mlp_forward(x, weights, biases, *, act=None,
                matmul_dtype=jnp.bfloat16, batch_tile=512):
    """Fused MLP forward pass.

    x:       [batch, in_features]  float32
    weights: list of [d_in, d_out] float32  (len = num_hidden + 1)
    biases:  list of [d_out]       float32  (len = num_hidden + 1)
    act:     None (Identity, the PyTorch default) or "relu"

    Returns (logits, penultimate).
    """
    num_hidden = len(weights) - 1
    batch, in_features = x.shape
    out_features = weights[-1].shape[1]
    pen_features = weights[-1].shape[0]

    # ---- feature padding to lane multiples (128) for lane-dense MXU/stores ----
    dims = [in_features] + [w.shape[1] for w in weights]
    pdims = [_round_up(d, _LANE) for d in dims]

    # ---- batch tiling: largest tile up to batch_tile, multiple of 8 ----
    tb = min(batch_tile, _round_up(batch, _SUBLANE))
    tb = _round_up(tb, _SUBLANE)
    batch_p = _round_up(batch, tb)
    grid = (batch_p // tb,)

    # ---- pad / cast operands ----
    x_p = jnp.zeros((batch_p, pdims[0]), matmul_dtype)
    x_p = x_p.at[:batch, :in_features].set(x.astype(matmul_dtype))

    args = [x_p]
    in_specs = [pl.BlockSpec((tb, pdims[0]), lambda i: (i, 0))]
    for li, (w, b) in enumerate(zip(weights, biases)):
        d_in, d_out = w.shape
        din_p, dout_p = pdims[li], pdims[li + 1]
        w_p = jnp.zeros((din_p, dout_p), matmul_dtype)
        w_p = w_p.at[:d_in, :d_out].set(w.astype(matmul_dtype))
        b_p = jnp.zeros((1, dout_p), jnp.float32)
        b_p = b_p.at[0, :d_out].set(b.astype(jnp.float32))
        args += [w_p, b_p]
        # weights/biases: constant index_map -> resident in VMEM across batch tiles
        in_specs.append(pl.BlockSpec((din_p, dout_p), lambda i: (0, 0)))
        in_specs.append(pl.BlockSpec((1, dout_p), lambda i: (0, 0)))

    out_pad = pdims[-1]
    pen_pad = pdims[-2]
    out_shape = (
        jax.ShapeDtypeStruct((batch_p, out_pad), jnp.float32),
        jax.ShapeDtypeStruct((batch_p, pen_pad), jnp.float32),
    )
    out_specs = (
        pl.BlockSpec((tb, out_pad), lambda i: (i, 0)),
        pl.BlockSpec((tb, pen_pad), lambda i: (i, 0)),
    )

    # ---- advisory cost estimate for XLA scheduling around the custom call ----
    flops = 2 * batch_p * sum(pdims[i] * pdims[i + 1] for i in range(len(pdims) - 1))
    bytes_accessed = sum(int(a.size) * a.dtype.itemsize for a in args)
    bytes_accessed += batch_p * (out_pad + pen_pad) * 4
    cost = pl.CostEstimate(flops=int(flops), transcendentals=0,
                           bytes_accessed=int(bytes_accessed))

    # ---- explicit VMEM budget (double-buffered blocks), clamped for v7x 64 MiB ----
    mm_isz = jnp.dtype(matmul_dtype).itemsize
    blk_bytes = 2 * tb * pdims[0] * mm_isz                       # x tile
    for li in range(len(weights)):
        blk_bytes += 2 * pdims[li] * pdims[li + 1] * mm_isz      # weight
        blk_bytes += 2 * pdims[li + 1] * 4                       # bias
    blk_bytes += 2 * tb * (out_pad + pen_pad) * 4                # outputs
    vmem_limit = int(min(64 << 20, max(32 << 20, 4 * blk_bytes)))

    kernel = partial(_mlp_kernel, num_hidden=num_hidden, act=act,
                     matmul_dtype=matmul_dtype)

    logits_p, pen_p = pl.pallas_call(
        kernel,
        out_shape=out_shape,
        grid=grid,
        in_specs=in_specs,
        out_specs=out_specs,
        compiler_params=pltpu.CompilerParams(
            dimension_semantics=("parallel",),   # batch tiles shard across TCs on v7x
            vmem_limit_bytes=vmem_limit,
        ),
        cost_estimate=cost,
    )(*args)

    # strip batch / feature padding
    return logits_p[:batch, :out_features], pen_p[:batch, :pen_features]


def init_mlp_params(key, in_features, hidden_features, out_features):
    """Deterministic init mimicking nn.Linear's U(-1/sqrt(fan_in), 1/sqrt(fan_in))."""
    dims = [in_features] + list(hidden_features) + [out_features]
    weights, biases = [], []
    for i in range(len(dims) - 1):
        key, kw, kb = jax.random.split(key, 3)
        bound = 1.0 / math.sqrt(dims[i])
        # stored as [d_in, d_out] (transpose of PyTorch's [out, in])
        w = jax.random.uniform(kw, (dims[i], dims[i + 1]), jnp.float32,
                               minval=-bound, maxval=bound)
        b = jax.random.uniform(kb, (dims[i + 1],), jnp.float32,
                               minval=-bound, maxval=bound)
        weights.append(w)
        biases.append(b)
    return weights, biases


def mlp_reference(x, weights, biases, act=None, matmul_dtype=jnp.bfloat16):
    """Pure-JAX reference using the same bf16-input / f32-accumulate matmuls."""
    h = x.astype(jnp.float32)
    for w, b in zip(weights[:-1], biases[:-1]):
        h = jnp.dot(h.astype(matmul_dtype), w.astype(matmul_dtype),
                    preferred_element_type=jnp.float32) + b
        if act == "relu":
            h = jnp.maximum(h, 0.0)
    pen = h
    logits = jnp.dot(pen.astype(matmul_dtype), weights[-1].astype(matmul_dtype),
                     preferred_element_type=jnp.float32) + biases[-1]
    return logits, pen


if __name__ == "__main__":
    key = jax.random.PRNGKey(0)

    batch = 32
    in_features = 16
    hidden_features = [32, 32]
    out_features = 8
    act = "relu"  # MLP(..., act_func=nn.ReLU()); use None for the default Identity

    key, kx = jax.random.split(key)
    x = jax.random.normal(kx, (batch, in_features), jnp.float32)
    weights, biases = init_mlp_params(key, in_features, hidden_features, out_features)

    # batch_tile=8 -> 4-step batch grid: exercises pipelined activation tiles
    # with weights resident in VMEM across steps.
    logits, penultimate = mlp_forward(x, weights, biases, act=act,
                                      matmul_dtype=jnp.bfloat16, batch_tile=8)
    jax.block_until_ready(logits)
    jax.block_until_ready(penultimate)

    ref_logits, ref_pen = mlp_reference(x, weights, biases, act=act,
                                        matmul_dtype=jnp.bfloat16)
    assert logits.shape == (batch, out_features)
    assert penultimate.shape == (batch, hidden_features[-1])
    # bf16 matmul inputs -> loosened tolerance vs the f32 PyTorch module
    assert jnp.allclose(logits, ref_logits, atol=2e-2, rtol=2e-2)
    assert jnp.allclose(penultimate, ref_pen, atol=2e-2, rtol=2e-2)

    print("KERNEL_OK")
</pallas_src>

<mosaic_0001>
module attributes {stable_mosaic.version = 11 : i64} {
  func.func @_mlp_kernel(%arg0: i32, %arg1: memref<8x128xbf16, #tpu.memory_space<vmem>>, %arg2: memref<128x128xbf16, #tpu.memory_space<vmem>>, %arg3: memref<1x128xf32, #tpu.memory_space<vmem>>, %arg4: memref<128x128xbf16, #tpu.memory_space<vmem>>, %arg5: memref<1x128xf32, #tpu.memory_space<vmem>>, %arg6: memref<128x128xbf16, #tpu.memory_space<vmem>>, %arg7: memref<1x128xf32, #tpu.memory_space<vmem>>, %arg8: memref<8x128xf32, #tpu.memory_space<vmem>>, %arg9: memref<8x128xf32, #tpu.memory_space<vmem>>) attributes {dimension_semantics = [#tpu.dimension_semantics<parallel>], iteration_bounds = array<i64: 4>, scalar_prefetch = 0 : i64, scratch_operands = 0 : i64, tpu.core_type = #tpu.core_type<tc>, window_params = [{transform_indices = @transform_0, window_bounds = array<i64: 8, 128>}, {pipeline_mode = #tpu.pipeline_mode<synchronous>, transform_indices = @transform_1, window_bounds = array<i64: 128, 128>}, {pipeline_mode = #tpu.pipeline_mode<synchronous>, transform_indices = @transform_2, window_bounds = array<i64: 1, 128>}, {pipeline_mode = #tpu.pipeline_mode<synchronous>, transform_indices = @transform_3, window_bounds = array<i64: 128, 128>}, {pipeline_mode = #tpu.pipeline_mode<synchronous>, transform_indices = @transform_4, window_bounds = array<i64: 1, 128>}, {pipeline_mode = #tpu.pipeline_mode<synchronous>, transform_indices = @transform_5, window_bounds = array<i64: 128, 128>}, {pipeline_mode = #tpu.pipeline_mode<synchronous>, transform_indices = @transform_6, window_bounds = array<i64: 1, 128>}, {transform_indices = @transform_7, window_bounds = array<i64: 8, 128>}, {transform_indices = @transform_8, window_bounds = array<i64: 8, 128>}]} {
    %c0 = arith.constant 0 : index
    %c0_0 = arith.constant 0 : index
    %0 = vector.load %arg1[%c0, %c0_0] : memref<8x128xbf16, #tpu.memory_space<vmem>>, vector<8x128xbf16>
    %c0_1 = arith.constant 0 : index
    %c0_2 = arith.constant 0 : index
    %1 = vector.load %arg2[%c0_1, %c0_2] : memref<128x128xbf16, #tpu.memory_space<vmem>>, vector<128x128xbf16>
    %c0_3 = arith.constant 0 : index
    %c0_4 = arith.constant 0 : index
    %2 = vector.load %arg3[%c0_3, %c0_4] : memref<1x128xf32, #tpu.memory_space<vmem>>, vector<1x128xf32>
    %cst = arith.constant dense<0.000000e+00> : vector<8x128xf32>
    %3 = tpu.matmul %0, %1, %cst {dimension_numbers = #tpu.dot_dimension_numbers<[1], [0], [0], [1], [0, 0, 1, 1], [], []>} : vector<8x128xbf16>, vector<128x128xbf16>, vector<8x128xf32> -> vector<8x128xf32>
    %4 = vector.broadcast %2 : vector<1x128xf32> to vector<8x128xf32>
    %5 = arith.addf %3, %4 : vector<8x128xf32>
    %cst_5 = arith.constant 0.000000e+00 : f32
    %6 = vector.broadcast %cst_5 : f32 to vector<8x128xf32>
    %7 = arith.maximumf %5, %6 : vector<8x128xf32>
    %8 = arith.truncf %7 : vector<8x128xf32> to vector<8x128xbf16>
    %c0_6 = arith.constant 0 : index
    %c0_7 = arith.constant 0 : index
    %9 = vector.load %arg4[%c0_6, %c0_7] : memref<128x128xbf16, #tpu.memory_space<vmem>>, vector<128x128xbf16>
    %c0_8 = arith.constant 0 : index
    %c0_9 = arith.constant 0 : index
    %10 = vector.load %arg5[%c0_8, %c0_9] : memref<1x128xf32, #tpu.memory_space<vmem>>, vector<1x128xf32>
    %cst_10 = arith.constant dense<0.000000e+00> : vector<8x128xf32>
    %11 = tpu.matmul %8, %9, %cst_10 {dimension_numbers = #tpu.dot_dimension_numbers<[1], [0], [0], [1], [0, 0, 1, 1], [], []>} : vector<8x128xbf16>, vector<128x128xbf16>, vector<8x128xf32> -> vector<8x128xf32>
    %12 = vector.broadcast %10 : vector<1x128xf32> to vector<8x128xf32>
    %13 = arith.addf %11, %12 : vector<8x128xf32>
    %cst_11 = arith.constant 0.000000e+00 : f32
    %14 = vector.broadcast %cst_11 : f32 to vector<8x128xf32>
    %15 = arith.maximumf %13, %14 : vector<8x128xf32>
    %16 = arith.truncf %15 : vector<8x128xf32> to vector<8x128xbf16>
    %c0_12 = arith.constant 0 : index
    %c0_13 = arith.constant 0 : index
    %17 = vector.load %arg9[%c0_12, %c0_13] : memref<8x128xf32, #tpu.memory_space<vmem>>, vector<8x128xf32>
    tpu.vector_store %arg9[%c0_12, %c0_13], %15 {strides = array<i32>} : memref<8x128xf32, #tpu.memory_space<vmem>>, vector<8x128xf32>,
    %c0_14 = arith.constant 0 : index
    %c0_15 = arith.constant 0 : index
    %18 = vector.load %arg6[%c0_14, %c0_15] : memref<128x128xbf16, #tpu.memory_space<vmem>>, vector<128x128xbf16>
    %c0_16 = arith.constant 0 : index
    %c0_17 = arith.constant 0 : index
    %19 = vector.load %arg7[%c0_16, %c0_17] : memref<1x128xf32, #tpu.memory_space<vmem>>, vector<1x128xf32>
    %cst_18 = arith.constant dense<0.000000e+00> : vector<8x128xf32>
    %20 = tpu.matmul %16, %18, %cst_18 {dimension_numbers = #tpu.dot_dimension_numbers<[1], [0], [0], [1], [0, 0, 1, 1], [], []>} : vector<8x128xbf16>, vector<128x128xbf16>, vector<8x128xf32> -> vector<8x128xf32>
    %21 = vector.broadcast %19 : vector<1x128xf32> to vector<8x128xf32>
    %22 = arith.addf %20, %21 : vector<8x128xf32>
    %c0_19 = arith.constant 0 : index
    %c0_20 = arith.constant 0 : index
    %23 = vector.load %arg8[%c0_19, %c0_20] : memref<8x128xf32, #tpu.memory_space<vmem>>, vector<8x128xf32>
    tpu.vector_store %arg8[%c0_19, %c0_20], %22 {strides = array<i32>} : memref<8x128xf32, #tpu.memory_space<vmem>>, vector<8x128xf32>,
    return
  }
  func.func @transform_0(%arg0: i32) -> (i32, i32) {
    %c0_i32 = arith.constant 0 : i32
    %c0_i32_0 = arith.constant 0 : i32
    return %arg0, %c0_i32 : i32, i32
  }
  func.func @transform_1(%arg0: i32) -> (i32, i32) {
    %c0_i32 = arith.constant 0 : i32
    %c0_i32_0 = arith.constant 0 : i32
    %c0_i32_1 = arith.constant 0 : i32
    return %c0_i32, %c0_i32_0 : i32, i32
  }
  func.func @transform_2(%arg0: i32) -> (i32, i32) {
    %c0_i32 = arith.constant 0 : i32
    %c0_i32_0 = arith.constant 0 : i32
    %c0_i32_1 = arith.constant 0 : i32
    return %c0_i32, %c0_i32_0 : i32, i32
  }
  func.func @transform_3(%arg0: i32) -> (i32, i32) {
    %c0_i32 = arith.constant 0 : i32
    %c0_i32_0 = arith.constant 0 : i32
    %c0_i32_1 = arith.constant 0 : i32
    return %c0_i32, %c0_i32_0 : i32, i32
  }
  func.func @transform_4(%arg0: i32) -> (i32, i32) {
    %c0_i32 = arith.constant 0 : i32
    %c0_i32_0 = arith.constant 0 : i32
    %c0_i32_1 = arith.constant 0 : i32
    return %c0_i32, %c0_i32_0 : i32, i32
  }
  func.func @transform_5(%arg0: i32) -> (i32, i32) {
    %c0_i32 = arith.constant 0 : i32
    %c0_i32_0 = arith.constant 0 : i32
    %c0_i32_1 = arith.constant 0 : i32
    return %c0_i32, %c0_i32_0 : i32, i32
  }
  func.func @transform_6(%arg0: i32) -> (i32, i32) {
    %c0_i32 = arith.constant 0 : i32
    %c0_i32_0 = arith.constant 0 : i32
    %c0_i32_1 = arith.constant 0 : i32
    return %c0_i32, %c0_i32_0 : i32, i32
  }
  func.func @transform_7(%arg0: i32) -> (i32, i32) {
    %c0_i32 = arith.constant 0 : i32
    %c0_i32_0 = arith.constant 0 : i32
    return %arg0, %c0_i32 : i32, i32
  }
  func.func @transform_8(%arg0: i32) -> (i32, i32) {
    %c0_i32 = arith.constant 0 : i32
    %c0_i32_0 = arith.constant 0 : i32
    return %arg0, %c0_i32 : i32, i32
  }
}

</mosaic_0001>

<bundles_post_ra>
// kernel: tpu_custom_call.1
= control target key start
LH: loop header
LB: loop body
LE: loop exit
PB: predicated region body
PF: predicated region fallthrough
CT: control target
= control target key end

     0   :  { %s1644_s0 = inlined_call_operand.hbm [shape: bf16[32,128], index: 0, kind: input, shape index: {}]   ;;  %s1645_s1 = inlined_call_operand.hbm [shape: bf16[128,128], index: 1, kind: input, shape index: {}]   ;;  %s1646_s2 = inlined_call_operand.vmem [shape: f32[1,128], index: 2, kind: input, shape index: {}]   ;;  %s1647_s3 = inlined_call_operand.hbm [shape: bf16[128,128], index: 3, kind: input, shape index: {}]   ;;  %s1648_s4 = inlined_call_operand.vmem [shape: f32[1,128], index: 4, kind: input, shape index: {}]   ;;  %s1649_s5 = inlined_call_operand.hbm [shape: bf16[128,128], index: 5, kind: input, shape index: {}]   ;;  %s1650_s6 = inlined_call_operand.vmem [shape: f32[1,128], index: 6, kind: input, shape index: {}]   ;;  %s1651_s7 = inlined_call_operand.hbm [shape: f32[32,128], index: 7, kind: output, shape index: {0}]   ;;  %s1652_s8 = inlined_call_operand.hbm [shape: f32[32,128], index: 8, kind: output, shape index: {1}]  }
   0x1   :  { %1657 = sst [smem:[#allocation18_spill]] %s1645_s1 }
   0x2   :  { %1658 = sst [smem:[#allocation19_spill]] %s1647_s3 }
   0x3   :  { %1659 = sst [smem:[#allocation20_spill]] %s1649_s5 }
   0x4   :  { %14 = vsyncpa [#allocation3], 0 }
   0x5   :  { %16 = vsyncpa [#allocation3 + $0x1], 0 }
   0x6   :  { %17 = vsyncpa [#allocation6], 0 }
   0x7   :  { %18 = vsyncpa [#allocation9], 0 }
   0x8   :  { %19 = vsyncpa [#allocation4], 0 }
   0x9   :  { %21 = vsyncpa [#allocation4 + $0x1], 0 }
   0xa   :  { %22 = vsyncpa [#allocation12], 0 }
   0xb   :  { %24 = vsyncpa [#allocation12 + $0x1], 0  ;;  %s1390_s27 = smov 0   ;;  %s1392_s28 = smov 0  }
   0xc   :  { %s1394_s29 = smov 0   ;;  %s1396_s30 = smov 0  }
   0xd LB: > { %s1411_s9 = sadd.s32 4294967295, %s1333_s30   ;;  %s880_s10 = sadd.s32 4294967294, %s1333_s30   ;;  %s1333_s30 = sphi %s1396_s30, %s1681_s30   ;;  %s1329_s29 = sphi %s1394_s29, %s1680_s29   ;;  %s1325_s28 = sphi %s1392_s28, %s1679_s28   ;;  %s1321_s27 = sphi %s1390_s27, %s1678_s27  }
   0xe   : > { %p50_p0 = scmp.ne.s32.totalorder %s1325_s28, %s1321_s27  ;;  %p1653_p1 = scmp.eq.s32.totalorder %s1411_s9, 0 }
   0xf   : > { %p206_p3 = scmp.eq.s32.totalorder %s880_s10, 3  ;;  %p881_p5 = scmp.ge.s32.totalorder %s1333_s30, 1 }
  0x10   : > { %p1420_p4 = por %p1653_p1, %p50_p0  ;;  %p239_p7 = scmp.lt.s32.totalorder %s1333_s30, 5 }
  0x11   : > { %p1425_p6 = por %p206_p3, %p50_p0  ;;  %s1335_s14 = smov [#allocation5]  }
  0x12   : > { %s1660_s11 = scalar_select %p1420_p4, 1, 0 }
  0x13   : > { %s1661_s12 = scalar_select %p1425_p6, 1, 0 }
  0x14   : > { %p1430_p8 = pnand %p881_p5, %p239_p7  ;;  %s251_s15 = sshll.u32 %s1335_s14, 4  ;;  %s252_s15 = int_to_ptr.vmem [resolvable:$true] %s251_s15 }
  0x15   : > { %s1336_s17 = smov [#allocation7]   ;;  %s1337_s19 = smov [#allocation8]  }
  0x16   : > { %s1662_s13 = scalar_select %p1430_p8, 1, 0 }
  0x17   : > { %p1033_p9 = pneg %p1430_p8  ;;  %s267_s18 = sshll.u32 %s1336_s17, 4  ;;  %s268_s18 = int_to_ptr.vmem [resolvable:$true] %s267_s18 }
  0x18   : > { %s283_s20 = sshll.u32 %s1337_s19, 4  ;;  %s1136_s21 = scalar_lea.vmem %s252_s15, 1024  ;;  %s284_s20 = int_to_ptr.vmem [resolvable:$true] %s283_s20 }
  0x19   : > { %p1438_p10 = pnand %p1033_p9, %p1653_p1  ;;  %p1137_p12 = scmp.ne.s32.totalorder %s252_s15, %s1136_s21 }
  0x1a   : > { %p1144_p3 = scmp.lt.s32.totalorder %s252_s15, %s252_s15  ;;  %p1145_p5 = scmp.lt.s32.totalorder %s1136_s21, %s1136_s21 }
  0x1b   : > { %p1127_p11 = pneg %p1438_p10 }
  0x1c   : > { %p1146_p7 = por %p1145_p5, %p1144_p3 }
  0x1d   : > { %p1139_p13 = pnand %p1137_p12, %p1127_p11 }
  0x1f   : > { %p1140_p0 = pneg %p1139_p13 }
  0x21   : > { %p1147_p9 = pnand %p1146_p7, %p1140_p0 }
  0x23   : > { %1150 = shalt.err (!%p1147_p9)
}
  0x24   : > { %s1338_s22 = smov 64   ;;  %s1339_s23 = smov 4  }
  0x25   : > { %s1664_s1 = sld [smem:[#allocation18_spill]]  ;;  %s1162_s26 = scalar_lea.vmem %s268_s18, 1024 }
  0x26   : > { %p1163_p1 = scmp.ne.s32.totalorder %s268_s18, %s1162_s26  ;;  %p1170_p2 = scmp.lt.s32.totalorder %s268_s18, %s268_s18 }
  0x27   : > { %p1171_p6 = scmp.lt.s32.totalorder %s1162_s26, %s1162_s26 }
  0x28   : > { %p1165_p12 = pnand %p1163_p1, %p1127_p11 }
  0x29   : > { %p1172_p3 = por %p1171_p6, %p1170_p2 }
  0x2a   : > { %p1166_p13 = pneg %p1165_p12 }
  0x2b   : > { %1036 = dma.hbm_to_vmem [thread:$0]  (!%p1438_p10), %s1664_s1, 1024, %s252_s15, [#allocation6], %s1338_s22, %s1338_s22, %s1339_s23  }
  0x2c   : > { %p1173_p0 = pnand %p1172_p3, %p1166_p13 }
  0x2e   : > { %1176 = shalt.err (!%p1173_p0)
}
  0x2f   : > { %s1665_s3 = sld [smem:[#allocation19_spill]]  ;;  %s1188_s15 = scalar_lea.vmem %s284_s20, 1024 }
  0x30   : > { %p1189_p5 = scmp.ne.s32.totalorder %s284_s20, %s1188_s15  ;;  %p1196_p9 = scmp.lt.s32.totalorder %s284_s20, %s284_s20 }
  0x31   : > { %p1197_p12 = scmp.lt.s32.totalorder %s1188_s15, %s1188_s15 }
  0x32   : > { %p1191_p7 = pnand %p1189_p5, %p1127_p11 }
  0x33   : > { %p1198_p4 = por %p1197_p12, %p1196_p9 }
  0x34   : > { %p1192_p1 = pneg %p1191_p7 }
  0x35   : > { %1039 = dma.hbm_to_vmem [thread:$0]  (!%p1438_p10), %s1665_s3, 1024, %s268_s18, [#allocation6], %s1338_s22, %s1338_s22, %s1339_s23  }
  0x36   : > { %p1199_p2 = pnand %p1198_p4, %p1192_p1 }
  0x38   : > { %1202 = shalt.err (!%p1199_p2)
}
  0x39   : > { %s1666_s5 = sld [smem:[#allocation20_spill]]  ;;  %s1469_s18 = sadd.s32 1, %s1333_s30  }
  0x3a   : > { %s34_s21 = ssub.s32 %s1333_s30, %s1469_s18  ;;  %s37_s16 = sadd.s32 1, %s1329_s29 }
  0x3b   : > { %p35_p4 = scmp.eq.s32.totalorder %s34_s21, 0  ;;  %p44_p6 = scmp.ne.s32.totalorder %s1329_s29, %s1325_s28 }
  0x3c   : > { %p45_p11 = scmp.eq.s32.totalorder %s1333_s30, 0  ;;  %p1057_p13 = scmp.lt.s32.totalorder %s1333_s30, 4 }
  0x3d   : > { %s1479_s24 = scalar_select %p35_p4, %s1329_s29, %s37_s16  }
  0x3e   : > { %p46_p3 = por %p45_p11, %p44_p6  ;;  %p1667_p0 = scmp.eq.s32.totalorder %s1411_s9, 3 }
  0x3f   : > { %1042 = dma.hbm_to_vmem [thread:$0]  (!%p1438_p10), %s1666_s5, 1024, %s284_s20, [#allocation9], %s1338_s22, %s1338_s22, %s1339_s23  }
  0x40   : > { %p1483_p5 = por %p1667_p0, %p44_p6  ;;  %s300_s26 = sand.u32 1, %s1329_s29  }
  0x41   : > { %s887_s10 = sshll.u32 %s1333_s30, 6  ;;  %s886_s20 = sshll.u32 %s300_s26, 2 }
  0x42   : > { %s1668_s25 = scalar_select %p1483_p5, 1, 0 }
  0x43   : > { %s1492_s14 = scalar_lea.hbm %s1644_s0, %s887_s10  ;;  %s304_s15 = scalar_lea.vmem [#allocation2], %s886_s20 }
  0x44   : > { %s311_s17 = sshll.u32 %s304_s15, 4  ;;  %p1494_p10 = pnand %p1057_p13, %p46_p3  ;;  %s312_s17 = int_to_ptr.vmem [resolvable:$true] %s311_s17 }
  0x45   : > { %s301_s21 = scalar_lea.sflag [#allocation3], %s300_s26  ;;  %s1203_s16 = scalar_lea.hbm %s1492_s14, 64 }
  0x46   : > { %p1204_p7 = scmp.ne.s32.totalorder %s1492_s14, %s1203_s16  ;;  %p1205_p1 = pneg %p1494_p10 }
  0x47   : > { %s1208_s23 = scalar_lea.hbm %s1644_s0, 256  ;;  %p1209_p2 = scmp.lt.s32.totalorder %s1492_s14, %s1644_s0 }
  0x48   : > { %p1206_p9 = pnand %p1205_p1, %p1204_p7  ;;  %p1210_p4 = scmp.lt.s32.totalorder %s1208_s23, %s1203_s16 }
  0x4a   : > { %p1207_p12 = pneg %p1206_p9  ;;  %p1211_p6 = por %p1210_p4, %p1209_p2 }
  0x4c   : > { %p1212_p11 = pnand %p1211_p6, %p1207_p12 }
  0x4e   : > { %1215 = shalt.err (!%p1212_p11)
}
  0x4f   : > { %s1216_s15 = scalar_lea.vmem %s312_s17, 64  ;;  %s1340_s26 = smov [#allocation2]  }
  0x50   : > { %p1217_p13 = scmp.ne.s32.totalorder %s312_s17, %s1216_s15  ;;  %s1221_s3 = sshll.u32 %s1340_s26, 4  ;;  %s1222_s3 = int_to_ptr.vmem [resolvable:$false] %s1221_s3 }
  0x51   : > { %s1223_s5 = scalar_lea.vmem %s1222_s3, 128  ;;  %p1224_p7 = scmp.lt.s32.totalorder %s312_s17, %s1222_s3 }
  0x52   : > { %p1219_p3 = pnand %p1217_p13, %p1205_p1  ;;  %p1225_p9 = scmp.lt.s32.totalorder %s1223_s5, %s1216_s15 }
  0x54   : > { %p1220_p0 = pneg %p1219_p3  ;;  %p1226_p5 = por %p1225_p9, %p1224_p7 }
  0x56   : > { %p1227_p8 = pnand %p1226_p5, %p1220_p0 }
  0x58   : > { %1230 = shalt.err (!%p1227_p8)
}
  0x59   : > { %1046 = dma.hbm_to_vmem [thread:$0]  (!%p1494_p10), %s1492_s14, 64, %s312_s17, %s301_s21  }
  0x5a   : > { %p1670_p12 = scmp.ne.s32.totalorder %s1662_s13, 0 }
  0x5b   : > { %s1515_s1 = sand.u32 (!%p1670_p12), 1, %s1325_s28   ;;  %p1671_p1 = scmp.ne.s32.totalorder (!%p1670_p12), %s1660_s11, 0 }
  0x5c   : > { %320 = sbr.rel (%p1670_p12) target bundleno = 746 (0x2ea), region = 48  ;;  %s889_s16 = sshll.u32 (!%p1670_p12), %s1515_s1, 2 }
  0x5d   : > { %s323_s10 = scalar_lea.sflag (!%p1670_p12), [#allocation3], %s1515_s1  ;;  %s1519_s3 = scalar_lea.vmem (!%p1670_p12), [#allocation2], %s889_s16 }
  0x61   : > { %1300 = dma.done.wait (%p1671_p1), %s323_s10, 64  }
  0x62   : > { %1302 = vsyncadd (%p1671_p1), %s323_s10, 4294967232  ;;  %p1672_p8 = scmp.eq.s32.totalorder %s1411_s9, 0 }
  0x64   : > { %1304 = dma.done.wait (%p1672_p8), [#allocation6], 2048   ;;  %p1673_p5 = pmov %p1672_p8 }
  0x66   : > { %1306 = vsyncadd (%p1673_p5), [#allocation6], 4294965248  ;;  %p1674_p10 = pmov %p1673_p5 }
  0x67   : > { %p1675_p2 = pmov %p1673_p5 }
  0x68   : > { %1308 = dma.done.wait (%p1674_p10), [#allocation9], 1024  }
  0x69   : > { %1310 = vsyncadd (%p1675_p2), [#allocation9], 4294966272  ;;  %v1341_v0 = vmov 0.0   ;;  %vm1342_vm0 = vmmov 0   ;;  %v1101_v1 = vld [vmem:[#allocation5 + $0x38] sm:$0xff]   ;;  %v1102_v2 = vld [vmem:[#allocation5 + $0x30] sm:$0xff]  }
  0x6a   : > { %955 = vmatprep.subr.bf16.mxu0 %v1341_v0  ;;  %971 = vmatprep.mubr.msk.bf16.mxu0 %vm1342_vm0, %v1341_v0  ;;  %v1103_v3 = vld [vmem:[#allocation5 + $0x28] sm:$0xff]   ;;  %v1109_v4 = vld [vmem:[#allocation7 + $0x38] sm:$0xff]   ;;  %v1104_v5 = vld [vmem:[#allocation5 + $0x20] sm:$0xff]   ;;  %s893_s17 = sshll.u32 %s1515_s1, 3  ;;  %s924_s21 = sshll.u32 %s1411_s9, 7 }
  0x6b   : > { %975 = vmatprep.subr.bf16.mxu1 %v1341_v0  ;;  %991 = vmatprep.mubr.msk.bf16.mxu1 %vm1342_vm0, %v1341_v0  ;;  %v1110_v6 = vld [vmem:[#allocation7 + $0x30] sm:$0xff]   ;;  %v1105_v7 = vld [vmem:[#allocation5 + $0x18] sm:$0xff]   ;;  %v1111_v8 = vld [vmem:[#allocation7 + $0x28] sm:$0xff]   ;;  %s375_s19 = scalar_lea.vmem [#allocation11], %s893_s17  ;;  %s747_s20 = scalar_lea.hbm %s1652_s8, %s924_s21 }
  0x6c   : > { %956 = vmatpush3.bf16.msra.mxu0 %v1101_v1  ;;  %976 = vmatpush3.bf16.msra.mxu1 %v1109_v4  ;;  %v1106_v9 = vld [vmem:[#allocation5 + $0x10] sm:$0xff]   ;;  %v1112_v10 = vld [vmem:[#allocation7 + $0x20] sm:$0xff]   ;;  %v1107_v11 = vld [vmem:[#allocation5 + $0x8] sm:$0xff]   ;;  %s749_s15 = sshll.u32 %s375_s19, 4  ;;  %s723_s26 = scalar_lea.sflag [#allocation12], %s1515_s1  ;;  %s750_s15 = int_to_ptr.vmem [resolvable:$true] %s749_s15 }
  0x6d   : > { %957 = vmatprep.subr.bf16.mxu0 %v1341_v0  ;;  %977 = vmatprep.subr.bf16.mxu1 %v1341_v0  ;;  %v1113_v12 = vld [vmem:[#allocation7 + $0x18] sm:$0xff]   ;;  %v1108_v13 = vld [vmem:[#allocation5] sm:$0xff]   ;;  %v1114_v14 = vld [vmem:[#allocation7 + $0x10] sm:$0xff]   ;;  %s1231_s16 = scalar_lea.vmem %s750_s15, 128  ;;  %p1676_p6 = scmp.ne.s32.totalorder %s1668_s25, 0 }
  0x6e   : > { %v377_v15 = vld [vmem:[%s1519_s3] sm:$0xf]  ;;  %v1115_v16 = vld [vmem:[#allocation7 + $0x8] sm:$0xff]   ;;  %v1116_v17 = vld [vmem:[#allocation7] sm:$0xff]   ;;  %p1232_p4 = scmp.ne.s32.totalorder %s750_s15, %s1231_s16  ;;  %s1343_s10 = smov [#allocation11]  }
  0x6f   : > { %v1117_v18 = vld [vmem:[#allocation8 + $0x38] sm:$0xff]   ;;  %v1118_v19 = vld [vmem:[#allocation8 + $0x30] sm:$0xff]   ;;  %v1119_v20 = vld [vmem:[#allocation8 + $0x28] sm:$0xff]   ;;  %s1235_s3 = sshll.u32 %s1343_s10, 4  ;;  %s1236_s3 = int_to_ptr.vmem [resolvable:$false] %s1235_s3 }
  0x70   : > { %958 = vmatpush3.bf16.msra.mxu0 %v1102_v2  ;;  %978 = vmatpush3.bf16.msra.mxu1 %v1110_v6  ;;  %v1120_v21 = vld [vmem:[#allocation8 + $0x20] sm:$0xff]   ;;  %v1121_v22 = vld [vmem:[#allocation8 + $0x18] sm:$0xff]   ;;  %v1122_v23 = vld [vmem:[#allocation8 + $0x10] sm:$0xff]   ;;  %p1233_p11 = pnand %p1232_p4, %p1676_p6  ;;  %s1237_s5 = scalar_lea.vmem %s1236_s3, 256 }
  0x71   : > { %959 = vmatprep.subr.bf16.mxu0 %v1341_v0  ;;  %979 = vmatprep.subr.bf16.mxu1 %v1341_v0  ;;  %v895_v24 = vld [vmem:[%s1646_s2] ss:$0 sm:$0xff]  ;;  %v1123_v32 = vld [vmem:[#allocation8 + $0x8] sm:$0xff]   ;;  %v1124_v33 = vld [vmem:[#allocation8] sm:$0xff]   ;;  %p1238_p3 = scmp.lt.s32.totalorder %s750_s15, %s1236_s3  ;;  %p1239_p0 = scmp.lt.s32.totalorder %s1237_s5, %s1231_s16 }
  0x72   : > { %v904_v34 = vld [vmem:[%s1648_s4] ss:$0 sm:$0xff]  ;;  %p1234_p13 = pneg %p1233_p11 }
  0x73   : > { %p1240_p7 = por %p1239_p0, %p1238_p3 }
  0x74   : > { %960 = vmatpush3.bf16.msra.mxu0 %v1103_v3  ;;  %980 = vmatpush3.bf16.msra.mxu1 %v1111_v8 }
  0x75   : > { %961 = vmatprep.subr.bf16.mxu0 %v1341_v0  ;;  %981 = vmatprep.subr.bf16.mxu1 %v1341_v0  ;;  %p1241_p9 = pnand %p1240_p7, %p1234_p13 }
  0x78   : > { %962 = vmatpush3.bf16.msra.mxu0 %v1104_v5  ;;  %982 = vmatpush3.bf16.msra.mxu1 %v1112_v10 }
  0x79   : > { %963 = vmatprep.subr.bf16.mxu0 %v1341_v0  ;;  %983 = vmatprep.subr.bf16.mxu1 %v1341_v0 }
  0x7c   : > { %964 = vmatpush3.bf16.msra.mxu0 %v1105_v7  ;;  %984 = vmatpush3.bf16.msra.mxu1 %v1113_v12 }
  0x7d   : > { %965 = vmatprep.subr.bf16.mxu0 %v1341_v0  ;;  %985 = vmatprep.subr.bf16.mxu1 %v1341_v0 }
  0x80   : > { %966 = vmatpush3.bf16.msra.mxu0 %v1106_v9  ;;  %986 = vmatpush3.bf16.msra.mxu1 %v1114_v14 }
  0x81   : > { %967 = vmatprep.subr.bf16.mxu0 %v1341_v0  ;;  %987 = vmatprep.subr.bf16.mxu1 %v1341_v0 }
  0x84   : > { %968 = vmatpush3.bf16.msra.mxu0 %v1107_v11  ;;  %988 = vmatpush3.bf16.msra.mxu1 %v1115_v16 }
  0x85   : > { %969 = vmatprep.subr.bf16.mxu0 %v1341_v0  ;;  %989 = vmatprep.subr.bf16.mxu1 %v1341_v0 }
  0x88   : > { %970 = vmatpush3.bf16.msra.mxu0 %v1108_v13  ;;  %990 = vmatpush3.bf16.msra.mxu1 %v1116_v17 }
  0x89   : > { %995 = vmatprep.subr.bf16.mxu0 %v1341_v0 }
  0x8b   : > { %972 = vmatmul.mubr.bf16.vlgmr.msra.gmra.mxu0 %v377_v15 }
  0x8c   : > { %1011 = vmatprep.mubr.msk.bf16.mxu0 %vm1342_vm0, %v1341_v0  ;;  %996 = vmatpush3.bf16.msra.mxu0 %v1117_v18 }
  0x8d   : > { %997 = vmatprep.subr.bf16.mxu0 %v1341_v0 }
  0x90   : > { %998 = vmatpush3.bf16.msra.mxu0 %v1118_v19 }
  0x91   : > { %999 = vmatprep.subr.bf16.mxu0 %v1341_v0 }
  0x94   : > { %1000 = vmatpush3.bf16.msra.mxu0 %v1119_v20 }
  0x95   : > { %1001 = vmatprep.subr.bf16.mxu0 %v1341_v0 }
  0x98   : > { %1002 = vmatpush3.bf16.msra.mxu0 %v1120_v21 }
  0x99   : > { %1003 = vmatprep.subr.bf16.mxu0 %v1341_v0 }
  0x9c   : > { %1004 = vmatpush3.bf16.msra.mxu0 %v1121_v22 }
  0x9d   : > { %1005 = vmatprep.subr.bf16.mxu0 %v1341_v0 }
  0xa0   : > { %1006 = vmatpush3.bf16.msra.mxu0 %v1122_v23 }
  0xa1   : > { %1007 = vmatprep.subr.bf16.mxu0 %v1341_v0 }
  0xa4   : > { %1008 = vmatpush3.bf16.msra.mxu0 %v1123_v32 }
  0xa5   : > { %1009 = vmatprep.subr.bf16.mxu0 %v1341_v0 }
  0xa8   : > { %1010 = vmatpush3.bf16.msra.mxu0 %v1124_v33 }
 0x14b   : > { %v483_v25 = vpop.f32.mrf.mxu0 }
 0x14c   : > { %v484_v26 = vadd.f32 %v895_v24, %v483_v25 }
 0x14d   : > { %v973_v27 = vpop.f32.mrf.mxu0 }
 0x14e   : > { %v489_v28 = vmax.f32 %v484_v26, 0.0 }
 0x14f   : > { %v486_v29 = vpop.f32.mrf.mxu0 }
 0x150   : > { %v490_v30 = vpack.c.bf16 %v489_v28, %v489_v28 }
 0x151   : > { %v974_v31 = vpop.f32.mrf.mxu0 }
 0x152   : > { %992 = vmatmul.mubr.bf16.vlgmr.msra.gmra.mxu1 %v490_v30 }
 0x212   : > { %v596_v35 = vpop.f32.mrf.mxu1 }
 0x213   : > { %v597_v36 = vadd.f32 %v904_v34, %v596_v35 }
 0x214   : > { %v993_v37 = vpop.f32.mrf.mxu1 }
 0x215   : > { %v602_v38 = vmax.f32 %v597_v36, 0.0 }
 0x216   : > { %v599_v39 = vpop.f32.mrf.mxu1 }
 0x217   : > { %v603_v40 = vpack.c.bf16 %v602_v38, %v602_v38  ;;  %604 = vst [vmem:[%s375_s19] sm:$0xff] %v602_v38 }
 0x218   : > { %v994_v41 = vpop.f32.mrf.mxu1 }
 0x219   : > { %1012 = vmatmul.mubr.bf16.vlgmr.msra.gmra.mxu0 %v603_v40 }
 0x21a   : > { %1244 = shalt.err (!%p1241_p9)
}
 0x21b   : > { %s1245_s11 = scalar_lea.hbm %s747_s20, 128  ;;  %s1249_s19 = scalar_lea.hbm %s1652_s8, 512 }
 0x21c   : > { %p1246_p12 = scmp.ne.s32.totalorder %s747_s20, %s1245_s11  ;;  %p1250_p5 = scmp.lt.s32.totalorder %s747_s20, %s1652_s8 }
 0x21d   : > { %p1251_p10 = scmp.lt.s32.totalorder %s1249_s19, %s1245_s11 }
 0x21e   : > { %p1247_p1 = pnand %p1246_p12, %p1676_p6 }
 0x21f   : > { %p1252_p2 = por %p1251_p10, %p1250_p5 }
 0x220   : > { %p1248_p8 = pneg %p1247_p1 }
 0x222   : > { %p1253_p4 = pnand %p1252_p2, %p1248_p8 }
 0x224   : > { %1256 = shalt.err (!%p1253_p4)
}
 0x225   : > { %1030 = dma.vmem_to_hbm [thread:$0]  (%p1676_p6), %s750_s15, 128, %s747_s20, %s723_s26   ;;  %v913_v42 = vld [vmem:[%s1650_s6] ss:$0 sm:$0xff] }
 0x226   : > { %s368_s3 = scalar_lea.vmem [#allocation10], %s893_s17  ;;  %s1602_s14 = scalar_lea.hbm %s1651_s7, %s924_s21 }
 0x227   : > { %s736_s5 = sshll.u32 %s368_s3, 4  ;;  %s718_s20 = scalar_lea.sflag [#allocation4], %s1515_s1  ;;  %s1604_s5 = int_to_ptr.vmem [resolvable:$true] %s736_s5 }
 0x228   : > { %s1257_s15 = scalar_lea.vmem %s1604_s5, 128  ;;  %s1344_s9 = smov [#allocation10]  }
 0x229   : > { %p1258_p11 = scmp.ne.s32.totalorder %s1604_s5, %s1257_s15  ;;  %s1261_s17 = sshll.u32 %s1344_s9, 4  ;;  %s1262_s17 = int_to_ptr.vmem [resolvable:$false] %s1261_s17 }
 0x22a   : > { %s1263_s26 = scalar_lea.vmem %s1262_s17, 256  ;;  %p1264_p0 = scmp.lt.s32.totalorder %s1604_s5, %s1262_s17 }
 0x22b   : > { %p1259_p13 = pnand %p1258_p11, %p1676_p6  ;;  %p1265_p7 = scmp.lt.s32.totalorder %s1263_s26, %s1257_s15 }
 0x22d   : > { %p1260_p3 = pneg %p1259_p13  ;;  %p1266_p9 = por %p1265_p7, %p1264_p0 }
 0x22f   : > { %p1267_p12 = pnand %p1266_p9, %p1260_p3 }
 0x2d9   : > { %v710_v43 = vpop.f32.mrf.mxu0 }
 0x2da   : > { %v711_v44 = vadd.f32 %v913_v42, %v710_v43 }
 0x2db   : > { %v1013_v45 = vpop.f32.mrf.mxu0 }
 0x2dc   : > { %716 = vst [vmem:[%s368_s3] sm:$0xff] %v711_v44 }
 0x2dd   : > { %v713_v46 = vpop.f32.mrf.mxu0 }
 0x2de   : > { %1270 = shalt.err (!%p1267_p12)
}
 0x2df   : > { %s1271_s21 = scalar_lea.hbm %s1602_s14, 128  ;;  %s1275_s22 = scalar_lea.hbm %s1651_s7, 512 }
 0x2e0   : > { %p1272_p1 = scmp.ne.s32.totalorder %s1602_s14, %s1271_s21  ;;  %p1276_p10 = scmp.lt.s32.totalorder %s1602_s14, %s1651_s7 }
 0x2e1   : > { %p1277_p2 = scmp.lt.s32.totalorder %s1275_s22, %s1271_s21 }
 0x2e2   : > { %p1273_p8 = pnand %p1272_p1, %p1676_p6 }
 0x2e3   : > { %p1278_p4 = por %p1277_p2, %p1276_p10 }
 0x2e4   : > { %p1274_p5 = pneg %p1273_p8 }
 0x2e6   : > { %p1279_p11 = pnand %p1278_p4, %p1274_p5 }
 0x2e8   : > { %1282 = shalt.err (!%p1279_p11)
}
 0x2e9   : > { %1029 = dma.vmem_to_hbm [thread:$0]  (%p1676_p6), %s1604_s5, 128, %s1602_s14, %s718_s20   ;;  %v1014_v47 = vpop.f32.mrf.mxu0 }
 0x2ea PF: > { %p1061_p13 = scmp.ge.s32.totalorder %s1333_s30, 2  ;;  %s761_s10 = sand.u32 1, %s1321_s27  }
 0x2eb   : > { %p1677_p3 = scmp.ne.s32.totalorder %s1661_s12, 0  ;;  %s762_s3 = scalar_lea.sflag [#allocation4], %s761_s10 }
 0x2ed   : > { %p1048_p0 = pnand %p1061_p13, %p1677_p3 }
 0x2ef   : > { %p1049_p7 = pneg %p1048_p0 }
 0x2f1   : > { %1312 = dma.done.wait (%p1049_p7), %s762_s3, 128  }
 0x2f2   : > { %1314 = vsyncadd (%p1049_p7), %s762_s3, 4294967168  ;;  %s771_s11 = scalar_lea.sflag [#allocation12], %s761_s10 }
 0x2f3   : > { %1316 = dma.done.wait (%p1049_p7), %s771_s11, 128  }
 0x2f4   : > { %1318 = vsyncadd (%p1049_p7), %s771_s11, 4294967168  ;;  %p27_p6 = scmp.ge.s32.totalorder %s1469_s18, 6   ;;  %s1678_s27 = smov %s1325_s28 }
 0x2f5   : > { %s1679_s28 = smov %s1329_s29  ;;  %s1680_s29 = smov %s1479_s24 }
 0x2f6   : > { %s1681_s30 = smov %s1469_s18  ;;  %29 = sbr.rel (!%p27_p6) target bundleno = 13 (0xd), region = 122 }
 0x2fb   :  { %776 = vsyncpa [#allocation3], 1 }
 0x2fc   :  { %778 = vsyncpa [#allocation3 + $0x1], 1 }
 0x2fd   :  { %779 = vsyncpa [#allocation6], 1 }
 0x2fe   :  { %780 = vsyncpa [#allocation9], 1 }
 0x2ff   :  { %781 = vsyncpa [#allocation4], 1 }
 0x300   :  { %783 = vsyncpa [#allocation4 + $0x1], 1 }
 0x301   :  { %784 = vsyncpa [#allocation12], 1 }
 0x302   :  { %786 = vsyncpa [#allocation12 + $0x1], 1 }

</bundles_post_ra>
